<compile_context>
chip_gen: v7x
topology: tpu7x:2x2x1
jax: 0.10.0
libtpu: 0.0.40
codegen_flags: <defaults>
</compile_context>

<pallas_src>
import functools

import numpy as np
import jax
import jax.numpy as jnp
from jax.experimental import pallas as pl
from jax.experimental.pallas import tpu as pltpu

_MIB = 1024 * 1024


def _dino_loss_kernel(student_ref, teacher_ref, center_ref,
                      loss_part_ref, csum_part_ref,
                      te_scr, z_scr, acc_scr, self_scr, selflz_scr, slz_scr,
                      *, ncrops, inv_s, inv_t):
    """One (row-block, student-crop) grid step of the DINO loss.

    student_ref   : VMEM (1, tb, D)   input dtype  -- crop `v` of this row block
    teacher_ref   : VMEM (2, tb, D)   input dtype  -- resident across crop axis
    center_ref    : VMEM (1, D)       f32
    loss_part_ref : VMEM (1, 1, 128)  f32  per-block partial loss (lane-broadcast)
    csum_part_ref : VMEM (1, 1, D)    f32  per-block teacher column sum
    te_scr        : VMEM (2, tb, D)   f32  teacher exp numerators (cached at v==0)
    z_scr/acc_scr/self_scr/selflz_scr : VMEM (2, tb, 1) f32
    slz_scr       : VMEM (tb, 1)      f32  running sum of student log-partitions
    """
    v = pl.program_id(1)
    last = ncrops - 1

    # ---- per-row-block init: teacher softmax numerators + accumulators ----
    @pl.when(v == 0)
    def _init():
        center = center_ref[...].astype(jnp.float32)                   # (1, D)
        csum = None
        for iq in range(2):
            t_raw = teacher_ref[iq].astype(jnp.float32)                # (tb, D)
            c = jnp.sum(t_raw, axis=0, keepdims=True)                  # (1, D)
            csum = c if csum is None else csum + c
            tl = (t_raw - center) * inv_t
            tm = jnp.max(tl, axis=-1, keepdims=True)
            te = jnp.exp(tl - tm)                                      # (tb, D)
            te_scr[iq] = te
            z_scr[iq] = jnp.sum(te, axis=-1, keepdims=True)            # (tb, 1)
        csum_part_ref[...] = csum[None]                                # (1,1,D)
        acc_scr[...] = jnp.zeros_like(acc_scr)
        self_scr[...] = jnp.zeros_like(self_scr)
        selflz_scr[...] = jnp.zeros_like(selflz_scr)
        slz_scr[...] = jnp.zeros_like(slz_scr)

    # ---- per-crop work: shifted logits + (tb, 1) dot-column accumulation ----
    x = student_ref[0].astype(jnp.float32) * inv_s                     # (tb, D)
    m = jnp.max(x, axis=-1, keepdims=True)
    sh = x - m                                                         # (tb, D)
    lz = jnp.log(jnp.sum(jnp.exp(sh), axis=-1, keepdims=True))         # (tb, 1)
    slz_scr[...] += lz
    for iq in range(2):
        d_iq = jnp.sum(te_scr[iq] * sh, axis=-1, keepdims=True)        # (tb, 1)
        acc_scr[iq] += d_iq

        @pl.when(v == iq)
        def _self(d_iq=d_iq, lz=lz, iq=iq):
            self_scr[iq] = d_iq
            selflz_scr[iq] = lz

    # ---- finalize row block after the last crop ----
    @pl.when(v == last)
    def _finalize():
        total = jnp.zeros((), jnp.float32)
        for iq in range(2):
            contrib = ((self_scr[iq] - acc_scr[iq]) / z_scr[iq]        # exact div
                       + (slz_scr[...] - selflz_scr[iq]))              # (tb, 1)
            total = total + jnp.sum(contrib)
        loss_part_ref[...] = jnp.broadcast_to(total, (1, 1, 128))


def _vmem_budgets():
    """(tiling budget, scoped-vmem cap) derived from the chip's real VMEM."""
    try:
        cap = int(pltpu.get_tpu_info().vmem_capacity_bytes)
    except Exception:
        cap = 64 * _MIB                      # conservative default (v7x-sized)
    if cap <= 80 * _MIB:                     # v7x: 64 MiB per TensorCore
        return 26 * _MIB, 46 * _MIB
    return 88 * _MIB, 104 * _MIB             # v5e / v6e: 128 MiB


def _per_row_bytes(d, in_bytes):
    # Double-buffered student (1 crop) + teacher (2 crops) + f32 teacher-exp
    # scratch (2 crops) + ~4 full-width f32 compiler temporaries.
    return d * (2 * 1 * in_bytes + 2 * 2 * in_bytes + 2 * 4 + 4 * 4)


def _choose_tile_b(batch, d, in_bytes, budget_bytes):
    """Largest multiple-of-8 row tile that divides `batch` and fits VMEM."""
    per_row = _per_row_bytes(d, in_bytes)
    if batch <= 8 or batch % 8 != 0:
        # Single full-batch block (block dim == full array dim is legal).
        if batch * per_row > budget_bytes:
            # TODO(synk): pad + mask ragged batches instead of refusing them.
            raise ValueError(
                f"batch={batch} (not a multiple of 8) does not fit in VMEM as "
                f"a single block for out_dim={d}")
        return batch
    max_rows = max(8, int(budget_bytes // max(per_row, 1)))
    tb = min(batch, (max_rows // 8) * 8)
    # Megacore (v7x): keep at least 2 row blocks when the batch allows it.
    if batch >= 16 and tb > batch // 2:
        tb = max(8, ((batch // 2) // 8) * 8)
    while batch % tb != 0:
        tb -= 8
    return max(tb, 8)


class DINOLossPallas:
    """Functional JAX/Pallas port of the PyTorch DINOLoss module (forward)."""

    def __init__(self, out_dim, ncrops, warmup_teacher_temp, teacher_temp,
                 warmup_teacher_temp_epochs, nepochs, student_temp=0.1,
                 center_momentum=0.9):
        self.student_temp = float(student_temp)
        self.center_momentum = float(center_momentum)
        self.ncrops = int(ncrops)
        self.out_dim = int(out_dim)
        self.center = jnp.zeros((1, out_dim), dtype=jnp.float32)
        self.teacher_temp_schedule = np.concatenate((
            np.linspace(warmup_teacher_temp, teacher_temp,
                        warmup_teacher_temp_epochs),
            np.ones(nepochs - warmup_teacher_temp_epochs) * teacher_temp,
        ))

    def __call__(self, student_output, teacher_output, epoch, tile_b=None):
        """Returns (total_loss, new_center); the caller carries the center."""
        # TODO(synk): forward-only; training through this needs a custom_vjp.
        n_student, d = student_output.shape
        n_teacher, d2 = teacher_output.shape
        assert d == d2 == self.out_dim
        assert n_student % self.ncrops == 0 and n_teacher % 2 == 0
        batch = n_student // self.ncrops
        assert n_teacher == 2 * batch

        temp = float(self.teacher_temp_schedule[epoch])
        inv_s = 1.0 / self.student_temp
        inv_t = 1.0 / temp

        in_bytes = jnp.dtype(student_output.dtype).itemsize
        tiling_budget, vmem_cap = _vmem_budgets()
        if tile_b is None:
            tile_b = _choose_tile_b(batch, d, in_bytes, tiling_budget)
        assert batch % tile_b == 0
        num_blocks = batch // tile_b

        # Reshape (free) so each grid step can slice tile_b rows of one crop.
        student3 = student_output.reshape(self.ncrops, batch, d)
        teacher3 = teacher_output.reshape(2, batch, d)
        center = self.center.astype(jnp.float32)

        kernel = functools.partial(_dino_loss_kernel, ncrops=self.ncrops,
                                   inv_s=inv_s, inv_t=inv_t)

        # Per-step VMEM estimate: double-buffered inputs + scratch + f32 temps.
        est = 2 * 1 * tile_b * d * in_bytes          # student crop (dbl-buf)
        est += 2 * 2 * tile_b * d * in_bytes         # teacher (dbl-buf)
        est += 2 * d * 4                             # center
        est += 2 * tile_b * d * 4                    # teacher-exp scratch
        est += 6 * 2 * tile_b * 128 * 4              # small column scratches
        est += 2 * 2 * (128 + d) * 4                 # outputs (dbl-buf)
        est += 4 * tile_b * d * 4                    # f32 temporaries headroom
        vmem_limit = int(min(vmem_cap, max(est + 4 * _MIB, 16 * _MIB)))

        total_elems = (self.ncrops + 2) * batch * d
        cost = pl.CostEstimate(
            flops=8 * total_elems,
            transcendentals=total_elems,
            bytes_accessed=(total_elems * in_bytes + d * 4
                            + num_blocks * (128 + d) * 4))

        grid_spec = pltpu.PrefetchScalarGridSpec(
            num_scalar_prefetch=0,
            grid=(num_blocks, self.ncrops),
            in_specs=[
                pl.BlockSpec((1, tile_b, d), lambda r, v: (v, r, 0)),  # student
                pl.BlockSpec((2, tile_b, d), lambda r, v: (0, r, 0)),  # teacher
                pl.BlockSpec((1, d), lambda r, v: (0, 0)),             # center
            ],
            out_specs=(
                pl.BlockSpec((1, 1, 128), lambda r, v: (r, 0, 0)),
                pl.BlockSpec((1, 1, d), lambda r, v: (r, 0, 0)),
            ),
            scratch_shapes=[
                pltpu.VMEM((2, tile_b, d), jnp.float32),   # te_scr
                pltpu.VMEM((2, tile_b, 1), jnp.float32),   # z_scr
                pltpu.VMEM((2, tile_b, 1), jnp.float32),   # acc_scr
                pltpu.VMEM((2, tile_b, 1), jnp.float32),   # self_scr
                pltpu.VMEM((2, tile_b, 1), jnp.float32),   # selflz_scr
                pltpu.VMEM((tile_b, 1), jnp.float32),      # slz_scr
            ],
        )

        loss_parts, csum_parts = pl.pallas_call(
            kernel,
            out_shape=(
                jax.ShapeDtypeStruct((num_blocks, 1, 128), jnp.float32),
                jax.ShapeDtypeStruct((num_blocks, 1, d), jnp.float32),
            ),
            grid_spec=grid_spec,
            cost_estimate=cost,
            compiler_params=pltpu.CompilerParams(
                dimension_semantics=("parallel", "arbitrary"),
                vmem_limit_bytes=vmem_limit),
        )(student3, teacher3, center)

        n_terms = 2 * self.ncrops - min(2, self.ncrops)
        loss = jnp.sum(loss_parts[:, 0, 0]) * (1.0 / (batch * n_terms))

        batch_center = jnp.sum(csum_parts[:, 0, :], axis=0,
                               keepdims=True) * (1.0 / n_teacher)
        new_center = (center * self.center_momentum
                      + batch_center * (1.0 - self.center_momentum))
        return loss, new_center


def _reference(student_output, teacher_output, center, ncrops,
               student_temp, temp, center_momentum):
    """Pure-JAX reference matching the PyTorch forward, for validation."""
    batch = student_output.shape[0] // ncrops
    student_out = student_output / student_temp
    student_chunks = [student_out[v * batch:(v + 1) * batch] for v in range(ncrops)]
    teacher_sm = jax.nn.softmax((teacher_output - center) / temp, axis=-1)
    teacher_chunks = [teacher_sm[i * batch:(i + 1) * batch] for i in range(2)]
    total, n = 0.0, 0
    for iq, q in enumerate(teacher_chunks):
        for v in range(ncrops):
            if v == iq:
                continue
            loss = jnp.sum(-q * jax.nn.log_softmax(student_chunks[v], axis=-1),
                           axis=-1)
            total = total + loss.mean()
            n += 1
    total = total / n
    bc = jnp.sum(teacher_output, axis=0, keepdims=True) / teacher_output.shape[0]
    new_center = center * center_momentum + bc * (1 - center_momentum)
    return total, new_center


if __name__ == "__main__":
    out_dim = 256
    ncrops = 4
    batch = 16
    epoch = 3

    loss_mod = DINOLossPallas(
        out_dim=out_dim, ncrops=ncrops,
        warmup_teacher_temp=0.04, teacher_temp=0.07,
        warmup_teacher_temp_epochs=10, nepochs=100,
        student_temp=0.1, center_momentum=0.9)

    key = jax.random.PRNGKey(0)
    k1, k2 = jax.random.split(key)
    # bf16 inputs: DMA'd narrow, widened to f32 inside the kernel.
    student_output = jax.random.normal(
        k1, (ncrops * batch, out_dim), dtype=jnp.float32).astype(jnp.bfloat16)
    teacher_output = jax.random.normal(
        k2, (2 * batch, out_dim), dtype=jnp.float32).astype(jnp.bfloat16)

    # Auto tile -> tile_b=8, 2 row blocks x 4 crops: exercises the 2-D grid,
    # resident teacher block, and partial-reduction path.
    loss, new_center = loss_mod(student_output, teacher_output, epoch)
    jax.block_until_ready((loss, new_center))

    ref_loss, ref_center = _reference(
        student_output.astype(jnp.float32), teacher_output.astype(jnp.float32),
        loss_mod.center, ncrops, loss_mod.student_temp,
        float(loss_mod.teacher_temp_schedule[epoch]),
        loss_mod.center_momentum)

    assert np.allclose(np.asarray(loss), np.asarray(ref_loss),
                       rtol=1e-3, atol=1e-3), (loss, ref_loss)
    assert np.allclose(np.asarray(new_center), np.asarray(ref_center),
                       rtol=1e-3, atol=1e-4)
    print("KERNEL_OK")
</pallas_src>

<mosaic_0001>
module attributes {stable_mosaic.version = 11 : i64} {
  func.func @_dino_loss_kernel(%arg0: i32, %arg1: i32, %arg2: memref<1x8x256xbf16, #tpu.memory_space<vmem>>, %arg3: memref<2x8x256xbf16, #tpu.memory_space<vmem>>, %arg4: memref<1x256xf32, #tpu.memory_space<vmem>>, %arg5: memref<1x1x128xf32, #tpu.memory_space<vmem>>, %arg6: memref<1x1x256xf32, #tpu.memory_space<vmem>>, %arg7: memref<2x8x256xf32, #tpu.memory_space<vmem>>, %arg8: memref<2x8x1xf32, #tpu.memory_space<vmem>>, %arg9: memref<2x8x1xf32, #tpu.memory_space<vmem>>, %arg10: memref<2x8x1xf32, #tpu.memory_space<vmem>>, %arg11: memref<2x8x1xf32, #tpu.memory_space<vmem>>, %arg12: memref<8x1xf32, #tpu.memory_space<vmem>>) attributes {dimension_semantics = [#tpu.dimension_semantics<parallel>, #tpu.dimension_semantics<arbitrary>], iteration_bounds = array<i64: 2, 4>, scalar_prefetch = 0 : i64, scratch_operands = 6 : i64, tpu.core_type = #tpu.core_type<tc>, window_params = [{transform_indices = @transform_0, window_bounds = array<i64: 1, 8, 256>}, {transform_indices = @transform_1, window_bounds = array<i64: 2, 8, 256>}, {pipeline_mode = #tpu.pipeline_mode<synchronous>, transform_indices = @transform_2, window_bounds = array<i64: 1, 256>}, {transform_indices = @transform_3, window_bounds = array<i64: 1, 1, 128>}, {transform_indices = @transform_4, window_bounds = array<i64: 1, 1, 256>}]} {
    %c0_i32 = arith.constant 0 : i32
    %0 = arith.cmpi eq, %arg1, %c0_i32 : i32
    %1 = arith.extui %0 : i1 to i32
    %c0_i32_0 = arith.constant 0 : i32
    %2 = arith.cmpi ne, %1, %c0_i32_0 : i32
    scf.if %2 {
      %c0_32 = arith.constant 0 : index
      %c0_33 = arith.constant 0 : index
      %50 = vector.load %arg4[%c0_32, %c0_33] : memref<1x256xf32, #tpu.memory_space<vmem>>, vector<1x256xf32>
      %c0_34 = arith.constant 0 : index
      %c0_35 = arith.constant 0 : index
      %c0_36 = arith.constant 0 : index
      %51 = vector.load %arg3[%c0_34, %c0_35, %c0_36] : memref<2x8x256xbf16, #tpu.memory_space<vmem>>, vector<1x8x256xbf16>
      %52 = vector.shape_cast %51 : vector<1x8x256xbf16> to vector<8x256xbf16>
      %53 = arith.extf %52 : vector<8x256xbf16> to vector<8x256xf32>
      %cst_37 = arith.constant dense<0.000000e+00> : vector<256xf32>
      %54 = vector.multi_reduction <add>, %53, %cst_37 [0] : vector<8x256xf32> to vector<256xf32>
      %55 = vector.shape_cast %54 : vector<256xf32> to vector<1x256xf32>
      %56 = vector.broadcast %50 : vector<1x256xf32> to vector<8x256xf32>
      %57 = arith.subf %53, %56 : vector<8x256xf32>
      %cst_38 = arith.constant 2.000000e+01 : f32
      %58 = vector.broadcast %cst_38 : f32 to vector<8x256xf32>
      %59 = arith.mulf %57, %58 : vector<8x256xf32>
      %cst_39 = arith.constant dense<0xFF800000> : vector<8xf32>
      %60 = vector.multi_reduction <maximumf>, %59, %cst_39 [1] : vector<8x256xf32> to vector<8xf32>
      %61 = vector.shape_cast %60 : vector<8xf32> to vector<8x1xf32>
      %62 = vector.broadcast %61 : vector<8x1xf32> to vector<8x256xf32>
      %63 = arith.subf %59, %62 : vector<8x256xf32>
      %64 = math.exp %63 : vector<8x256xf32>
      %c0_40 = arith.constant 0 : index
      %c0_41 = arith.constant 0 : index
      %c0_42 = arith.constant 0 : index
      %65 = vector.load %arg7[%c0_40, %c0_41, %c0_42] : memref<2x8x256xf32, #tpu.memory_space<vmem>>, vector<1x8x256xf32>
      %66 = vector.shape_cast %65 : vector<1x8x256xf32> to vector<8x256xf32>
      %67 = vector.shape_cast %64 : vector<8x256xf32> to vector<1x8x256xf32>
      tpu.vector_store %arg7[%c0_40, %c0_41, %c0_42], %67 {strides = array<i32>} : memref<2x8x256xf32, #tpu.memory_space<vmem>>, vector<1x8x256xf32>,
      %cst_43 = arith.constant dense<0.000000e+00> : vector<8xf32>
      %68 = vector.multi_reduction <add>, %64, %cst_43 [1] : vector<8x256xf32> to vector<8xf32>
      %69 = vector.shape_cast %68 : vector<8xf32> to vector<8x1xf32>
      %c0_44 = arith.constant 0 : index
      %c0_45 = arith.constant 0 : index
      %c0_46 = arith.constant 0 : index
      %70 = vector.load %arg8[%c0_44, %c0_45, %c0_46] : memref<2x8x1xf32, #tpu.memory_space<vmem>>, vector<1x8x1xf32>
      %71 = vector.shape_cast %70 : vector<1x8x1xf32> to vector<8x1xf32>
      %72 = vector.shape_cast %69 : vector<8x1xf32> to vector<1x8x1xf32>
      tpu.vector_store %arg8[%c0_44, %c0_45, %c0_46], %72 {strides = array<i32>} : memref<2x8x1xf32, #tpu.memory_space<vmem>>, vector<1x8x1xf32>,
      %c1_47 = arith.constant 1 : index
      %c0_48 = arith.constant 0 : index
      %c0_49 = arith.constant 0 : index
      %73 = vector.load %arg3[%c1_47, %c0_48, %c0_49] : memref<2x8x256xbf16, #tpu.memory_space<vmem>>, vector<1x8x256xbf16>
      %74 = vector.shape_cast %73 : vector<1x8x256xbf16> to vector<8x256xbf16>
      %75 = arith.extf %74 : vector<8x256xbf16> to vector<8x256xf32>
      %cst_50 = arith.constant dense<0.000000e+00> : vector<256xf32>
      %76 = vector.multi_reduction <add>, %75, %cst_50 [0] : vector<8x256xf32> to vector<256xf32>
      %77 = vector.shape_cast %76 : vector<256xf32> to vector<1x256xf32>
      %78 = arith.addf %55, %77 : vector<1x256xf32>
      %79 = vector.broadcast %50 : vector<1x256xf32> to vector<8x256xf32>
      %80 = arith.subf %75, %79 : vector<8x256xf32>
      %cst_51 = arith.constant 2.000000e+01 : f32
      %81 = vector.broadcast %cst_51 : f32 to vector<8x256xf32>
      %82 = arith.mulf %80, %81 : vector<8x256xf32>
      %cst_52 = arith.constant dense<0xFF800000> : vector<8xf32>
      %83 = vector.multi_reduction <maximumf>, %82, %cst_52 [1] : vector<8x256xf32> to vector<8xf32>
      %84 = vector.shape_cast %83 : vector<8xf32> to vector<8x1xf32>
      %85 = vector.broadcast %84 : vector<8x1xf32> to vector<8x256xf32>
      %86 = arith.subf %82, %85 : vector<8x256xf32>
      %87 = math.exp %86 : vector<8x256xf32>
      %c1_53 = arith.constant 1 : index
      %c0_54 = arith.constant 0 : index
      %c0_55 = arith.constant 0 : index
      %88 = vector.load %arg7[%c1_53, %c0_54, %c0_55] : memref<2x8x256xf32, #tpu.memory_space<vmem>>, vector<1x8x256xf32>
      %89 = vector.shape_cast %88 : vector<1x8x256xf32> to vector<8x256xf32>
      %90 = vector.shape_cast %87 : vector<8x256xf32> to vector<1x8x256xf32>
      tpu.vector_store %arg7[%c1_53, %c0_54, %c0_55], %90 {strides = array<i32>} : memref<2x8x256xf32, #tpu.memory_space<vmem>>, vector<1x8x256xf32>,
      %cst_56 = arith.constant dense<0.000000e+00> : vector<8xf32>
      %91 = vector.multi_reduction <add>, %87, %cst_56 [1] : vector<8x256xf32> to vector<8xf32>
      %92 = vector.shape_cast %91 : vector<8xf32> to vector<8x1xf32>
      %c1_57 = arith.constant 1 : index
      %c0_58 = arith.constant 0 : index
      %c0_59 = arith.constant 0 : index
      %93 = vector.load %arg8[%c1_57, %c0_58, %c0_59] : memref<2x8x1xf32, #tpu.memory_space<vmem>>, vector<1x8x1xf32>
      %94 = vector.shape_cast %93 : vector<1x8x1xf32> to vector<8x1xf32>
      %95 = vector.shape_cast %92 : vector<8x1xf32> to vector<1x8x1xf32>
      tpu.vector_store %arg8[%c1_57, %c0_58, %c0_59], %95 {strides = array<i32>} : memref<2x8x1xf32, #tpu.memory_space<vmem>>, vector<1x8x1xf32>,
      %96 = vector.shape_cast %78 : vector<1x256xf32> to vector<1x1x256xf32>
      %c0_60 = arith.constant 0 : index
      %c0_61 = arith.constant 0 : index
      %c0_62 = arith.constant 0 : index
      %97 = vector.load %arg6[%c0_60, %c0_61, %c0_62] : memref<1x1x256xf32, #tpu.memory_space<vmem>>, vector<1x1x256xf32>
      tpu.vector_store %arg6[%c0_60, %c0_61, %c0_62], %96 {strides = array<i32>} : memref<1x1x256xf32, #tpu.memory_space<vmem>>, vector<1x1x256xf32>,
      %cst_63 = arith.constant 0.000000e+00 : f32
      %98 = vector.broadcast %cst_63 : f32 to vector<2x8x1xf32>
      %c0_64 = arith.constant 0 : index
      %c0_65 = arith.constant 0 : index
      %c0_66 = arith.constant 0 : index
      %99 = vector.load %arg9[%c0_64, %c0_65, %c0_66] : memref<2x8x1xf32, #tpu.memory_space<vmem>>, vector<2x8x1xf32>
      tpu.vector_store %arg9[%c0_64, %c0_65, %c0_66], %98 {strides = array<i32>} : memref<2x8x1xf32, #tpu.memory_space<vmem>>, vector<2x8x1xf32>,
      %cst_67 = arith.constant 0.000000e+00 : f32
      %100 = vector.broadcast %cst_67 : f32 to vector<2x8x1xf32>
      %c0_68 = arith.constant 0 : index
      %c0_69 = arith.constant 0 : index
      %c0_70 = arith.constant 0 : index
      %101 = vector.load %arg10[%c0_68, %c0_69, %c0_70] : memref<2x8x1xf32, #tpu.memory_space<vmem>>, vector<2x8x1xf32>
      tpu.vector_store %arg10[%c0_68, %c0_69, %c0_70], %100 {strides = array<i32>} : memref<2x8x1xf32, #tpu.memory_space<vmem>>, vector<2x8x1xf32>,
      %cst_71 = arith.constant 0.000000e+00 : f32
      %102 = vector.broadcast %cst_71 : f32 to vector<2x8x1xf32>
      %c0_72 = arith.constant 0 : index
      %c0_73 = arith.constant 0 : index
      %c0_74 = arith.constant 0 : index
      %103 = vector.load %arg11[%c0_72, %c0_73, %c0_74] : memref<2x8x1xf32, #tpu.memory_space<vmem>>, vector<2x8x1xf32>
      tpu.vector_store %arg11[%c0_72, %c0_73, %c0_74], %102 {strides = array<i32>} : memref<2x8x1xf32, #tpu.memory_space<vmem>>, vector<2x8x1xf32>,
      %cst_75 = arith.constant 0.000000e+00 : f32
      %104 = vector.broadcast %cst_75 : f32 to vector<8x1xf32>
      %c0_76 = arith.constant 0 : index
      %c0_77 = arith.constant 0 : index
      %105 = vector.load %arg12[%c0_76, %c0_77] : memref<8x1xf32, #tpu.memory_space<vmem>>, vector<8x1xf32>
      tpu.vector_store %arg12[%c0_76, %c0_77], %104 {strides = array<i32>} : memref<8x1xf32, #tpu.memory_space<vmem>>, vector<8x1xf32>,
    } else {
    }
    %c0 = arith.constant 0 : index
    %c0_1 = arith.constant 0 : index
    %c0_2 = arith.constant 0 : index
    %3 = vector.load %arg2[%c0, %c0_1, %c0_2] : memref<1x8x256xbf16, #tpu.memory_space<vmem>>, vector<1x8x256xbf16>
    %4 = vector.shape_cast %3 : vector<1x8x256xbf16> to vector<8x256xbf16>
    %5 = arith.extf %4 : vector<8x256xbf16> to vector<8x256xf32>
    %cst = arith.constant 1.000000e+01 : f32
    %6 = vector.broadcast %cst : f32 to vector<8x256xf32>
    %7 = arith.mulf %5, %6 : vector<8x256xf32>
    %cst_3 = arith.constant dense<0xFF800000> : vector<8xf32>
    %8 = vector.multi_reduction <maximumf>, %7, %cst_3 [1] : vector<8x256xf32> to vector<8xf32>
    %9 = vector.shape_cast %8 : vector<8xf32> to vector<8x1xf32>
    %10 = vector.broadcast %9 : vector<8x1xf32> to vector<8x256xf32>
    %11 = arith.subf %7, %10 : vector<8x256xf32>
    %12 = math.exp %11 : vector<8x256xf32>
    %cst_4 = arith.constant dense<0.000000e+00> : vector<8xf32>
    %13 = vector.multi_reduction <add>, %12, %cst_4 [1] : vector<8x256xf32> to vector<8xf32>
    %14 = vector.shape_cast %13 : vector<8xf32> to vector<8x1xf32>
    %15 = math.log %14 : vector<8x1xf32>
    %c0_5 = arith.constant 0 : index
    %c0_6 = arith.constant 0 : index
    %16 = vector.load %arg12[%c0_5, %c0_6] : memref<8x1xf32, #tpu.memory_space<vmem>>, vector<8x1xf32>
    %17 = arith.addf %16, %15 : vector<8x1xf32>
    %c0_7 = arith.constant 0 : index
    %c0_8 = arith.constant 0 : index
    %18 = vector.load %arg12[%c0_7, %c0_8] : memref<8x1xf32, #tpu.memory_space<vmem>>, vector<8x1xf32>
    tpu.vector_store %arg12[%c0_7, %c0_8], %17 {strides = array<i32>} : memref<8x1xf32, #tpu.memory_space<vmem>>, vector<8x1xf32>,
    %c0_9 = arith.constant 0 : index
    %c0_10 = arith.constant 0 : index
    %c0_11 = arith.constant 0 : index
    %19 = vector.load %arg7[%c0_9, %c0_10, %c0_11] : memref<2x8x256xf32, #tpu.memory_space<vmem>>, vector<1x8x256xf32>
    %20 = vector.shape_cast %19 : vector<1x8x256xf32> to vector<8x256xf32>
    %21 = arith.mulf %20, %11 : vector<8x256xf32>
    %cst_12 = arith.constant dense<0.000000e+00> : vector<8xf32>
    %22 = vector.multi_reduction <add>, %21, %cst_12 [1] : vector<8x256xf32> to vector<8xf32>
    %23 = vector.shape_cast %22 : vector<8xf32> to vector<8x1xf32>
    %c0_13 = arith.constant 0 : index
    %c0_14 = arith.constant 0 : index
    %c0_15 = arith.constant 0 : index
    %24 = vector.load %arg9[%c0_13, %c0_14, %c0_15] : memref<2x8x1xf32, #tpu.memory_space<vmem>>, vector<1x8x1xf32>
    %25 = vector.shape_cast %24 : vector<1x8x1xf32> to vector<8x1xf32>
    %26 = arith.addf %25, %23 : vector<8x1xf32>
    %c0_16 = arith.constant 0 : index
    %c0_17 = arith.constant 0 : index
    %c0_18 = arith.constant 0 : index
    %27 = vector.load %arg9[%c0_16, %c0_17, %c0_18] : memref<2x8x1xf32, #tpu.memory_space<vmem>>, vector<1x8x1xf32>
    %28 = vector.shape_cast %27 : vector<1x8x1xf32> to vector<8x1xf32>
    %29 = vector.shape_cast %26 : vector<8x1xf32> to vector<1x8x1xf32>
    tpu.vector_store %arg9[%c0_16, %c0_17, %c0_18], %29 {strides = array<i32>} : memref<2x8x1xf32, #tpu.memory_space<vmem>>, vector<1x8x1xf32>,
    %c0_i32_19 = arith.constant 0 : i32
    %30 = arith.cmpi eq, %arg1, %c0_i32_19 : i32
    %31 = arith.extui %30 : i1 to i32
    %c0_i32_20 = arith.constant 0 : i32
    %32 = arith.cmpi ne, %31, %c0_i32_20 : i32
    scf.if %32 {
      %c0_32 = arith.constant 0 : index
      %c0_33 = arith.constant 0 : index
      %c0_34 = arith.constant 0 : index
      %50 = vector.load %arg10[%c0_32, %c0_33, %c0_34] : memref<2x8x1xf32, #tpu.memory_space<vmem>>, vector<1x8x1xf32>
      %51 = vector.shape_cast %50 : vector<1x8x1xf32> to vector<8x1xf32>
      %52 = vector.shape_cast %23 : vector<8x1xf32> to vector<1x8x1xf32>
      tpu.vector_store %arg10[%c0_32, %c0_33, %c0_34], %52 {strides = array<i32>} : memref<2x8x1xf32, #tpu.memory_space<vmem>>, vector<1x8x1xf32>,
      %c0_35 = arith.constant 0 : index
      %c0_36 = arith.constant 0 : index
      %c0_37 = arith.constant 0 : index
      %53 = vector.load %arg11[%c0_35, %c0_36, %c0_37] : memref<2x8x1xf32, #tpu.memory_space<vmem>>, vector<1x8x1xf32>
      %54 = vector.shape_cast %53 : vector<1x8x1xf32> to vector<8x1xf32>
      %55 = vector.shape_cast %15 : vector<8x1xf32> to vector<1x8x1xf32>
      tpu.vector_store %arg11[%c0_35, %c0_36, %c0_37], %55 {strides = array<i32>} : memref<2x8x1xf32, #tpu.memory_space<vmem>>, vector<1x8x1xf32>,
    } else {
    }
    %c1 = arith.constant 1 : index
    %c0_21 = arith.constant 0 : index
    %c0_22 = arith.constant 0 : index
    %33 = vector.load %arg7[%c1, %c0_21, %c0_22] : memref<2x8x256xf32, #tpu.memory_space<vmem>>, vector<1x8x256xf32>
    %34 = vector.shape_cast %33 : vector<1x8x256xf32> to vector<8x256xf32>
    %35 = arith.mulf %34, %11 : vector<8x256xf32>
    %cst_23 = arith.constant dense<0.000000e+00> : vector<8xf32>
    %36 = vector.multi_reduction <add>, %35, %cst_23 [1] : vector<8x256xf32> to vector<8xf32>
    %37 = vector.shape_cast %36 : vector<8xf32> to vector<8x1xf32>
    %c1_24 = arith.constant 1 : index
    %c0_25 = arith.constant 0 : index
    %c0_26 = arith.constant 0 : index
    %38 = vector.load %arg9[%c1_24, %c0_25, %c0_26] : memref<2x8x1xf32, #tpu.memory_space<vmem>>, vector<1x8x1xf32>
    %39 = vector.shape_cast %38 : vector<1x8x1xf32> to vector<8x1xf32>
    %40 = arith.addf %39, %37 : vector<8x1xf32>
    %c1_27 = arith.constant 1 : index
    %c0_28 = arith.constant 0 : index
    %c0_29 = arith.constant 0 : index
    %41 = vector.load %arg9[%c1_27, %c0_28, %c0_29] : memref<2x8x1xf32, #tpu.memory_space<vmem>>, vector<1x8x1xf32>
    %42 = vector.shape_cast %41 : vector<1x8x1xf32> to vector<8x1xf32>
    %43 = vector.shape_cast %40 : vector<8x1xf32> to vector<1x8x1xf32>
    tpu.vector_store %arg9[%c1_27, %c0_28, %c0_29], %43 {strides = array<i32>} : memref<2x8x1xf32, #tpu.memory_space<vmem>>, vector<1x8x1xf32>,
    %c1_i32 = arith.constant 1 : i32
    %44 = arith.cmpi eq, %arg1, %c1_i32 : i32
    %45 = arith.extui %44 : i1 to i32
    %c0_i32_30 = arith.constant 0 : i32
    %46 = arith.cmpi ne, %45, %c0_i32_30 : i32
    scf.if %46 {
      %c1_32 = arith.constant 1 : index
      %c0_33 = arith.constant 0 : index
      %c0_34 = arith.constant 0 : index
      %50 = vector.load %arg10[%c1_32, %c0_33, %c0_34] : memref<2x8x1xf32, #tpu.memory_space<vmem>>, vector<1x8x1xf32>
      %51 = vector.shape_cast %50 : vector<1x8x1xf32> to vector<8x1xf32>
      %52 = vector.shape_cast %37 : vector<8x1xf32> to vector<1x8x1xf32>
      tpu.vector_store %arg10[%c1_32, %c0_33, %c0_34], %52 {strides = array<i32>} : memref<2x8x1xf32, #tpu.memory_space<vmem>>, vector<1x8x1xf32>,
      %c1_35 = arith.constant 1 : index
      %c0_36 = arith.constant 0 : index
      %c0_37 = arith.constant 0 : index
      %53 = vector.load %arg11[%c1_35, %c0_36, %c0_37] : memref<2x8x1xf32, #tpu.memory_space<vmem>>, vector<1x8x1xf32>
      %54 = vector.shape_cast %53 : vector<1x8x1xf32> to vector<8x1xf32>
      %55 = vector.shape_cast %15 : vector<8x1xf32> to vector<1x8x1xf32>
      tpu.vector_store %arg11[%c1_35, %c0_36, %c0_37], %55 {strides = array<i32>} : memref<2x8x1xf32, #tpu.memory_space<vmem>>, vector<1x8x1xf32>,
    } else {
    }
    %c3_i32 = arith.constant 3 : i32
    %47 = arith.cmpi eq, %arg1, %c3_i32 : i32
    %48 = arith.extui %47 : i1 to i32
    %c0_i32_31 = arith.constant 0 : i32
    %49 = arith.cmpi ne, %48, %c0_i32_31 : i32
    scf.if %49 {
      %c0_32 = arith.constant 0 : index
      %c0_33 = arith.constant 0 : index
      %c0_34 = arith.constant 0 : index
      %50 = vector.load %arg10[%c0_32, %c0_33, %c0_34] : memref<2x8x1xf32, #tpu.memory_space<vmem>>, vector<1x8x1xf32>
      %51 = vector.shape_cast %50 : vector<1x8x1xf32> to vector<8x1xf32>
      %c0_35 = arith.constant 0 : index
      %c0_36 = arith.constant 0 : index
      %c0_37 = arith.constant 0 : index
      %52 = vector.load %arg9[%c0_35, %c0_36, %c0_37] : memref<2x8x1xf32, #tpu.memory_space<vmem>>, vector<1x8x1xf32>
      %53 = vector.shape_cast %52 : vector<1x8x1xf32> to vector<8x1xf32>
      %54 = arith.subf %51, %53 : vector<8x1xf32>
      %c0_38 = arith.constant 0 : index
      %c0_39 = arith.constant 0 : index
      %c0_40 = arith.constant 0 : index
      %55 = vector.load %arg8[%c0_38, %c0_39, %c0_40] : memref<2x8x1xf32, #tpu.memory_space<vmem>>, vector<1x8x1xf32>
      %56 = vector.shape_cast %55 : vector<1x8x1xf32> to vector<8x1xf32>
      %57 = arith.divf %54, %56 : vector<8x1xf32>
      %c0_41 = arith.constant 0 : index
      %c0_42 = arith.constant 0 : index
      %58 = vector.load %arg12[%c0_41, %c0_42] : memref<8x1xf32, #tpu.memory_space<vmem>>, vector<8x1xf32>
      %c0_43 = arith.constant 0 : index
      %c0_44 = arith.constant 0 : index
      %c0_45 = arith.constant 0 : index
      %59 = vector.load %arg11[%c0_43, %c0_44, %c0_45] : memref<2x8x1xf32, #tpu.memory_space<vmem>>, vector<1x8x1xf32>
      %60 = vector.shape_cast %59 : vector<1x8x1xf32> to vector<8x1xf32>
      %61 = arith.subf %58, %60 : vector<8x1xf32>
      %62 = arith.addf %57, %61 : vector<8x1xf32>
      %63 = vector.shape_cast %62 : vector<8x1xf32> to vector<1x8x1xf32>
      %cst_46 = arith.constant dense<0.000000e+00> : vector<1xf32>
      %64 = vector.multi_reduction <add>, %63, %cst_46 [1, 2] : vector<1x8x1xf32> to vector<1xf32>
      %65 = vector.shape_cast %64 : vector<1xf32> to vector<1x1x1xf32>
      %66 = vector.extract %65[0, 0, 0] : f32 from vector<1x1x1xf32>
      %cst_47 = arith.constant 0.000000e+00 : f32
      %67 = arith.addf %cst_47, %66 : f32
      %c1_48 = arith.constant 1 : index
      %c0_49 = arith.constant 0 : index
      %c0_50 = arith.constant 0 : index
      %68 = vector.load %arg10[%c1_48, %c0_49, %c0_50] : memref<2x8x1xf32, #tpu.memory_space<vmem>>, vector<1x8x1xf32>
      %69 = vector.shape_cast %68 : vector<1x8x1xf32> to vector<8x1xf32>
      %c1_51 = arith.constant 1 : index
      %c0_52 = arith.constant 0 : index
      %c0_53 = arith.constant 0 : index
      %70 = vector.load %arg9[%c1_51, %c0_52, %c0_53] : memref<2x8x1xf32, #tpu.memory_space<vmem>>, vector<1x8x1xf32>
      %71 = vector.shape_cast %70 : vector<1x8x1xf32> to vector<8x1xf32>
      %72 = arith.subf %69, %71 : vector<8x1xf32>
      %c1_54 = arith.constant 1 : index
      %c0_55 = arith.constant 0 : index
      %c0_56 = arith.constant 0 : index
      %73 = vector.load %arg8[%c1_54, %c0_55, %c0_56] : memref<2x8x1xf32, #tpu.memory_space<vmem>>, vector<1x8x1xf32>
      %74 = vector.shape_cast %73 : vector<1x8x1xf32> to vector<8x1xf32>
      %75 = arith.divf %72, %74 : vector<8x1xf32>
      %c0_57 = arith.constant 0 : index
      %c0_58 = arith.constant 0 : index
      %76 = vector.load %arg12[%c0_57, %c0_58] : memref<8x1xf32, #tpu.memory_space<vmem>>, vector<8x1xf32>
      %c1_59 = arith.constant 1 : index
      %c0_60 = arith.constant 0 : index
      %c0_61 = arith.constant 0 : index
      %77 = vector.load %arg11[%c1_59, %c0_60, %c0_61] : memref<2x8x1xf32, #tpu.memory_space<vmem>>, vector<1x8x1xf32>
      %78 = vector.shape_cast %77 : vector<1x8x1xf32> to vector<8x1xf32>
      %79 = arith.subf %76, %78 : vector<8x1xf32>
      %80 = arith.addf %75, %79 : vector<8x1xf32>
      %81 = vector.shape_cast %80 : vector<8x1xf32> to vector<1x8x1xf32>
      %cst_62 = arith.constant dense<0.000000e+00> : vector<1xf32>
      %82 = vector.multi_reduction <add>, %81, %cst_62 [1, 2] : vector<1x8x1xf32> to vector<1xf32>
      %83 = vector.shape_cast %82 : vector<1xf32> to vector<1x1x1xf32>
      %84 = vector.extract %83[0, 0, 0] : f32 from vector<1x1x1xf32>
      %85 = arith.addf %67, %84 : f32
      %86 = vector.broadcast %85 : f32 to vector<1x1x128xf32>
      %c0_63 = arith.constant 0 : index
      %c0_64 = arith.constant 0 : index
      %c0_65 = arith.constant 0 : index
      %87 = vector.load %arg5[%c0_63, %c0_64, %c0_65] : memref<1x1x128xf32, #tpu.memory_space<vmem>>, vector<1x1x128xf32>
      tpu.vector_store %arg5[%c0_63, %c0_64, %c0_65], %86 {strides = array<i32>} : memref<1x1x128xf32, #tpu.memory_space<vmem>>, vector<1x1x128xf32>,
    } else {
    }
    return
  }
  func.func @transform_0(%arg0: i32, %arg1: i32) -> (i32, i32, i32) {
    %c0_i32 = arith.constant 0 : i32
    %c0_i32_0 = arith.constant 0 : i32
    return %arg1, %arg0, %c0_i32 : i32, i32, i32
  }
  func.func @transform_1(%arg0: i32, %arg1: i32) -> (i32, i32, i32) {
    %c0_i32 = arith.constant 0 : i32
    %c0_i32_0 = arith.constant 0 : i32
    %c0_i32_1 = arith.constant 0 : i32
    return %c0_i32, %arg0, %c0_i32_0 : i32, i32, i32
  }
  func.func @transform_2(%arg0: i32, %arg1: i32) -> (i32, i32) {
    %c0_i32 = arith.constant 0 : i32
    %c0_i32_0 = arith.constant 0 : i32
    %c0_i32_1 = arith.constant 0 : i32
    return %c0_i32, %c0_i32_0 : i32, i32
  }
  func.func @transform_3(%arg0: i32, %arg1: i32) -> (i32, i32, i32) {
    %c0_i32 = arith.constant 0 : i32
    %c0_i32_0 = arith.constant 0 : i32
    %c0_i32_1 = arith.constant 0 : i32
    return %arg0, %c0_i32, %c0_i32_0 : i32, i32, i32
  }
  func.func @transform_4(%arg0: i32, %arg1: i32) -> (i32, i32, i32) {
    %c0_i32 = arith.constant 0 : i32
    %c0_i32_0 = arith.constant 0 : i32
    %c0_i32_1 = arith.constant 0 : i32
    return %arg0, %c0_i32, %c0_i32_0 : i32, i32, i32
  }
}

</mosaic_0001>

<bundles_post_ra>
// kernel: tpu_custom_call.1
= control target key start
LH: loop header
LB: loop body
LE: loop exit
PB: predicated region body
PF: predicated region fallthrough
CT: control target
= control target key end

     0   :  { %10 = vsyncpa [#allocation9], 0  ;;  %s1455_s0 = inlined_call_operand.hbm [shape: bf16[4,16,256], index: 0, kind: input, shape index: {}]   ;;  %s1456_s1 = inlined_call_operand.hbm [shape: bf16[2,16,256], index: 1, kind: input, shape index: {}]   ;;  %s1457_s2 = inlined_call_operand.vmem [shape: f32[1,256], index: 2, kind: input, shape index: {}]   ;;  %s1458_s3 = inlined_call_operand.hbm [shape: f32[2,1,128], index: 3, kind: output, shape index: {0}]   ;;  %s1459_s4 = inlined_call_operand.hbm [shape: f32[2,1,256], index: 4, kind: output, shape index: {1}]  }
   0x1   :  { %12 = vsyncpa [#allocation9 + $0x1], 0 }
   0x2   :  { %13 = vsyncpa [#allocation12], 0 }
   0x3   :  { %15 = vsyncpa [#allocation12 + $0x1], 0 }
   0x4   :  { %16 = vsyncpa [#allocation10], 0 }
   0x5   :  { %18 = vsyncpa [#allocation10 + $0x1], 0 }
   0x6   :  { %19 = vsyncpa [#allocation15], 0 }
   0x7   :  { %21 = vsyncpa [#allocation15 + $0x1], 0  ;;  %s1096_s15 = smov 0   ;;  %s1098_s16 = smov 0  }
   0x8   :  { %s1100_s17 = smov 0   ;;  %s1102_s18 = smov 0  }
   0x9   :  { %s1104_s19 = smov 0   ;;  %s1106_s20 = smov 0  }
   0xa   :  { %s1108_s21 = smov 0   ;;  %s1110_s22 = smov 0  }
   0xb   :  { %s1112_s23 = smov 0   ;;  %s1114_s24 = smov 0  }
   0xc   :  { %s1116_s25 = smov 0  }
   0xd LB: > { %1467 = sst [smem:[#allocation20_spill]] %s1020_s15  ;;  %s675_s26 = sadd.s32 4294967295, %s1060_s25   ;;  %s1060_s25 = sphi %s1116_s25, %s27_s25   ;;  %s1056_s24 = sphi %s1114_s24, %s1502_s24   ;;  %s1052_s23 = sphi %s1112_s23, %s1501_s23   ;;  %s1048_s22 = sphi %s1110_s22, %s1500_s22   ;;  %s1044_s21 = sphi %s1108_s21, %s1499_s21   ;;  %s1040_s20 = sphi %s1106_s20, %s1491_s20   ;;  %s1036_s19 = sphi %s1104_s19, %s1498_s19   ;;  %s1032_s18 = sphi %s1102_s18, %s1497_s18   ;;  %s1028_s17 = sphi %s1100_s17, %s1496_s17   ;;  %s1024_s16 = sphi %s1098_s16, %s1495_s16   ;;  %s1020_s15 = sphi %s1096_s15, %s1494_s15  }
   0xe   : > { %1468 = sst [smem:[#allocation21_spill]] %s1040_s20  ;;  %s676_s27 = sadd.s32 4294967294, %s1060_s25  }
   0xf   : > { %s36_s28 = sadd.s32 1, %s1052_s23  ;;  %s39_s29 = sadd.s32 1, %s1056_s24 }
  0x10   : > { %p37_p0 = scmp.ge.s32.totalorder %s36_s28, 4  ;;  %s48_s30 = sadd.s32 1, %s1040_s20 }
  0x11   : > { %p55_p1 = scmp.ne.s32.totalorder %s1040_s20, %s1036_s19  ;;  %p56_p2 = scmp.eq.s32.totalorder %s1060_s25, 0 }
  0x12   : > { %s1504_s28 = smov (%p37_p0, %s36_s28), 0  ;;  %s1506_s29 = smov (!%p37_p0, %s39_s29), %s1056_s24 }
  0x13   : > { %1469 = sst [smem:[#allocation22_spill]] %s1504_s28  ;;  %s43_s5 = ssub.s32 %s1052_s23, %s1504_s28 }
  0x14   : > { %p1164_p3 = por %p56_p2, %p55_p1  ;;  %p41_p4 = scmp.ge.s32.totalorder %s1506_s29, 2 }
  0x15   : > { %p61_p5 = scmp.ne.s32.totalorder %s1036_s19, %s1032_s18  ;;  %p1169_p6 = scmp.eq.s32.totalorder %s675_s26, 0 }
  0x16   : > { %s74_s8 = sadd.s32 1, %s1028_s17  ;;  %s1508_s29 = smov (%p41_p4, %s1506_s29), 0 }
  0x17   : > { %1472 = sst [smem:[#allocation23_spill]] %s1508_s29  ;;  %p1178_p7 = por %p1169_p6, %p61_p5 }
  0x18   : > { %p81_p8 = scmp.ne.s32.totalorder %s1028_s17, %s1024_s16  ;;  %s44_s10 = ssub.s32 %s1056_s24, %s1508_s29 }
  0x19   : > { %s1473_s9 = scalar_select %p1178_p7, 1, 0 }
  0x1a   : > { %p87_p9 = scmp.ne.s32.totalorder %s1024_s16, %s1020_s15  ;;  %s45_s11 = sor.u32 %s44_s10, %s43_s5 }
  0x1b   : > { %p72_p10 = scmp.eq.s32.totalorder %s44_s10, 0  ;;  %p46_p11 = scmp.eq.s32.totalorder %s45_s11, 0 }
  0x1c   : > { %p1190_p12 = por %p81_p8, %p56_p2  ;;  %p1202_p13 = por %p87_p9, %p1169_p6 }
  0x1d   : > { %s1195_s13 = scalar_select %p72_p10, %s1028_s17, %s74_s8  }
  0x1e   : > { %s1198_s14 = scalar_select %p46_p11, %s1040_s20, %s48_s30  }
  0x1f   : > { %1475 = sst [smem:[#allocation24_spill]] %s1195_s13  ;;  %p132_p0 = scmp.eq.s32.totalorder %s675_s26, 7 }
  0x20   : > { %1476 = sst [smem:[#allocation25_spill]] %s1198_s14  ;;  %p138_p1 = scmp.eq.s32.totalorder %s676_s27, 7 }
  0x21   : > { %s1477_s18 = scalar_select %p1202_p13, 1, 0 }
  0x22   : > { %p1206_p2 = por %p132_p0, %p81_p8  ;;  %p729_p4 = scmp.lt.s32.totalorder %s1060_s25, 8 }
  0x23   : > { %p1211_p5 = por %p138_p1, %p87_p9  ;;  %s187_s7 = sand.u32 1, %s1040_s20  }
  0x24   : > { %s1478_s5 = scalar_select %p1206_p2, 1, 0 }
  0x25   : > { %s1479_s30 = scalar_select %p1211_p5, 1, 0 }
  0x26   : > { %s679_s8 = sshll.u32 %s187_s7, 3  ;;  %s680_s10 = sshll.u32 %s1056_s24, 1 }
  0x27   : > { %s681_s11 = sshll.u32 %s1052_s23, 2  ;;  %s191_s29 = scalar_lea.vmem [#allocation8], %s679_s8 }
  0x28   : > { %s201_s28 = sshll.u32 %s191_s29, 4  ;;  %s197_s26 = sadd.s32 %s681_s11, %s680_s10  ;;  %s1218_s28 = int_to_ptr.vmem [resolvable:$true] %s201_s28 }
  0x29   : > { %s682_s27 = sshll.u32 %s197_s26, 6  ;;  %p1224_p6 = pnand %p729_p4, %p1164_p3 }
  0x2a   : > { %s1231_s20 = scalar_lea.hbm %s1455_s0, %s682_s27  ;;  %p1237_p8 = pnand %p729_p4, %p1190_p12 }
  0x2b   : > { %s188_s6 = scalar_lea.sflag [#allocation9], %s187_s7  ;;  %s842_s8 = scalar_lea.hbm %s1231_s20, 128 }
  0x2c   : > { %p843_p9 = scmp.ne.s32.totalorder %s1231_s20, %s842_s8  ;;  %p844_p10 = pneg %p1224_p6 }
  0x2d   : > { %s847_s13 = scalar_lea.hbm %s1455_s0, 1024  ;;  %p848_p12 = scmp.lt.u32.totalorder %s1231_s20, %s1455_s0 }
  0x2e   : > { %p845_p11 = pnand %p844_p10, %p843_p9  ;;  %p849_p1 = scmp.lt.u32.totalorder %s847_s13, %s842_s8 }
  0x2f   : > { %p851_p3 = scmp.lt.u32.totalorder %s842_s8, %s1231_s20 }
  0x30   : > { %p846_p0 = pneg %p845_p11  ;;  %p850_p4 = por %p849_p1, %p848_p12 }
  0x32   : > { %p852_p5 = por %p851_p3, %p850_p4 }
  0x34   : > { %p853_p2 = pnand %p852_p5, %p846_p0 }
  0x36   : > { %856 = shalt.err (!%p853_p2)
}
  0x37   : > { %s857_s7 = scalar_lea.vmem %s1218_s28, 128  ;;  %s1062_s26 = smov [#allocation8]  }
  0x38   : > { %p858_p9 = scmp.ne.s32.totalorder %s1218_s28, %s857_s7  ;;  %s862_s27 = sshll.u32 %s1062_s26, 4  ;;  %s863_s27 = int_to_ptr.vmem [resolvable:$false] %s862_s27 }
  0x39   : > { %s864_s15 = scalar_lea.vmem %s863_s27, 256  ;;  %p865_p7 = scmp.lt.s32.totalorder %s1218_s28, %s863_s27 }
  0x3a   : > { %p860_p11 = pnand %p858_p9, %p844_p10  ;;  %p866_p12 = scmp.lt.s32.totalorder %s864_s15, %s857_s7 }
  0x3c   : > { %p861_p13 = pneg %p860_p11  ;;  %p867_p1 = por %p866_p12, %p865_p7 }
  0x3e   : > { %p868_p3 = pnand %p867_p1, %p861_p13 }
  0x40   : > { %871 = shalt.err (!%p868_p3)
}
  0x41   : > { %718 = dma.hbm_to_vmem [thread:$0]  (!%p1224_p6), %s1231_s20, 128, %s1218_s28, %s188_s6  }
  0x42   : > { %p227_p2 = scmp.lt.s32.totalorder %s1060_s25, 9  ;;  %s208_s8 = sand.u32 1, %s1028_s17  }
  0x43   : > { %s701_s12 = sshll.u32 %s1056_s24, 7  ;;  %p1482_p5 = scmp.ge.s32.totalorder %s1060_s25, 1 }
  0x44   : > { %s683_s10 = sshll.u32 %s208_s8, 4  ;;  %s1279_s7 = scalar_lea.hbm %s1456_s1, %s701_s12 }
  0x45   : > { %p1272_p10 = pnand %p1482_p5, %p227_p2  ;;  %s212_s26 = scalar_lea.vmem [#allocation11], %s683_s10 }
  0x46   : > { %s219_s20 = sshll.u32 %s212_s26, 4  ;;  %s1283_s28 = scalar_lea.sflag [#allocation12], %s208_s8  ;;  %s1281_s20 = int_to_ptr.vmem [resolvable:$true] %s219_s20 }
  0x47   : > { %s872_s6 = scalar_lea.hbm %s1279_s7, 256  ;;  %p874_p13 = pneg %p1237_p8 }
  0x48   : > { %p873_p7 = scmp.ne.s32.totalorder %s1279_s7, %s872_s6  ;;  %s877_s12 = scalar_lea.hbm %s1456_s1, 512 }
  0x49   : > { %p878_p4 = scmp.lt.u32.totalorder %s1279_s7, %s1456_s1  ;;  %p879_p9 = scmp.lt.u32.totalorder %s877_s12, %s872_s6 }
  0x4a   : > { %p875_p6 = pnand %p874_p13, %p873_p7  ;;  %p881_p12 = scmp.lt.u32.totalorder %s872_s6, %s1279_s7 }
  0x4b   : > { %p880_p11 = por %p879_p9, %p878_p4 }
  0x4c   : > { %p876_p0 = pneg %p875_p6 }
  0x4d   : > { %p882_p1 = por %p881_p12, %p880_p11 }
  0x4f   : > { %p883_p3 = pnand %p882_p1, %p876_p0 }
  0x51   : > { %886 = shalt.err (!%p883_p3)
}
  0x52   : > { %s887_s8 = scalar_lea.vmem %s1281_s20, 256  ;;  %s1063_s10 = smov [#allocation11]  }
  0x53   : > { %p888_p2 = scmp.ne.s32.totalorder %s1281_s20, %s887_s8  ;;  %s892_s26 = sshll.u32 %s1063_s10, 4  ;;  %s893_s26 = int_to_ptr.vmem [resolvable:$false] %s892_s26 }
  0x54   : > { %s894_s27 = scalar_lea.vmem %s893_s26, 512  ;;  %p895_p6 = scmp.lt.s32.totalorder %s1281_s20, %s893_s26 }
  0x55   : > { %p890_p5 = pnand %p888_p2, %p874_p13  ;;  %p896_p4 = scmp.lt.s32.totalorder %s894_s27, %s887_s8 }
  0x57   : > { %p891_p7 = pneg %p890_p5  ;;  %p897_p9 = por %p896_p4, %p895_p6 }
  0x59   : > { %p898_p11 = pnand %p897_p9, %p891_p7 }
  0x5b   : > { %901 = shalt.err (!%p898_p11)
}
  0x5c   : > { %s1064_s6 = smov 256   ;;  %s1065_s15 = smov 128  }
  0x5d   : > { %s1066_s12 = smov 8   ;;  %231 = sbr.rel (%p1272_p10) target bundleno = 1182 (0x49e), region = 32 }
  0x5e   : > { %721 = dma.hbm_to_vmem [thread:$0]  (!%p1237_p8), %s1279_s7, 256, %s1281_s20, %s1283_s28, %s1064_s6, %s1065_s15, %s1066_s12  }
  0x5f   : > { %s233_s11 = sand.u32 (!%p1272_p10), 1, %s1036_s19   ;;  %p1484_p13 = scmp.ne.s32.totalorder (!%p1272_p10), %s1473_s9, 0 }
  0x60   : > { %s1314_s14 = sshll.u32 (!%p1272_p10), %s233_s11, 3  ;;  %s234_s8 = scalar_lea.sflag (!%p1272_p10), [#allocation9], %s233_s11 }
  0x61   : > { %s237_s10 = scalar_lea.vmem (!%p1272_p10), [#allocation8], %s1314_s14 }
  0x64   : > { %1003 = dma.done.wait (%p1484_p13), %s234_s8, 128  }
  0x65   : > { %1005 = vsyncadd (%p1484_p13), %s234_s8, 4294967168  ;;  %s1322_s29 = sand.u32 1, %s1024_s16   ;;  %p1485_p8 = scmp.ne.s32.totalorder %s1477_s18, 0 }
  0x66   : > { %s688_s13 = sshll.u32 %s1322_s29, 4  ;;  %s243_s7 = scalar_lea.sflag [#allocation12], %s1322_s29 }
  0x67   : > { %s246_s20 = scalar_lea.vmem [#allocation11], %s688_s13 }
  0x68   : > { %1007 = dma.done.wait (%p1485_p8), %s243_s7, 256  }
  0x69   : > { %1009 = vsyncadd (%p1485_p8), %s243_s7, 4294967040  ;;  %s689_s28 = sshll.u32 %s1322_s29, 1  ;;  %s272_s26 = scalar_lea.vmem [#allocation13], %s1322_s29 }
  0x6a   : > { %s1332_s9 = scalar_lea.vmem [#allocation14], %s689_s28  ;;  %p690_p10 = scmp.ne.s32.totalorder %s1044_s21, 0 }
  0x6b   : > { %v285_v0 = vld [vmem:[%s246_s20] sm:$0xff] (!%p690_p10)  ;;  %v301_v1 = vlaneseq (!%p690_p10)  ;;  %v691_v2 = vld [vmem:[%s246_s20 + $0x8] sm:$0xff] (!%p690_p10)  ;;  %v1067_v23 = vmov (!%p690_p10), 1966171168   ;;  %vm329_vm1 = vcmask (!%p690_p10), 7168   ;;  %v1068_v56 = vmov (!%p690_p10), 0.0  }
  0x6c   : > { %283 = sbr.rel (%p690_p10) target bundleno = 428 (0x1ac), region = 44  ;;  %v286_v3 = vunpack.c.l.bf16 (!%p690_p10), %v285_v0  ;;  %v287_v4 = vunpack.c.h.bf16 (!%p690_p10), %v285_v0  ;;  %v333_v5 = vunpack.c.l.bf16 (!%p690_p10), %v691_v2  ;;  %v334_v7 = vunpack.c.h.bf16 (!%p690_p10), %v691_v2  ;;  %v284_v8 = vld [vmem:[%s1457_s2] sm:$0x3] (!%p690_p10)  ;;  %393 = vst.msk [vmem:[#allocation4] sm:$0xff] (!%p690_p10), %vm329_vm1, %v1068_v56  ;;  %394 = vst.msk [vmem:[#allocation4 + $0x8] sm:$0xff] (!%p690_p10), %vm329_vm1, %v1068_v56 }
  0x6d   : > { %v302_v6 = vshrl.u32 (!%p690_p10), %v301_v1, 7  ;;  %v374_v24 = vunpack.c.l.s4 (!%p690_p10), %v1067_v23  ;;  %vm390_vm0 = vcmp.lt.s32.totalorder (!%p690_p10), %v301_v1, 256  ;;  %395 = vst.msk [vmem:[#allocation5] sm:$0xff] (!%p690_p10), %vm329_vm1, %v1068_v56  ;;  %396 = vst.msk [vmem:[#allocation5 + $0x8] sm:$0xff] (!%p690_p10), %vm329_vm1, %v1068_v56 }
  0x6e   : > { %v288_v9 = vrot.slane (!%p690_p10), %v286_v3, 4  ;;  %v294_v10 = vrot.slane (!%p690_p10), %v287_v4, 4  ;;  %v335_v11 = vrot.slane (!%p690_p10), %v333_v5, 4  ;;  %v341_v14 = vrot.slane (!%p690_p10), %v334_v7, 4  ;;  %397 = vst.msk [vmem:[#allocation6] sm:$0xff] (!%p690_p10), %vm329_vm1, %v1068_v56  ;;  %398 = vst.msk [vmem:[#allocation6 + $0x8] sm:$0xff] (!%p690_p10), %vm329_vm1, %v1068_v56 }
  0x6f   : > { %v303_v12 = vsub.s32 (!%p690_p10), 0, %v302_v6  ;;  %v307_v13 = vsub.s32 (!%p690_p10), 1, %v302_v6  ;;  %v375_v43 = vunpack.c.0.s8 (!%p690_p10), %v374_v24  ;;  %399 = vst.msk [vmem:[#allocation7] sm:$0xff] (!%p690_p10), %vm329_vm1, %v1068_v56 }
  0x70   : > { %v289_v15 = vadd.f32 (!%p690_p10), %v288_v9, %v286_v3  ;;  %v295_v16 = vadd.f32 (!%p690_p10), %v294_v10, %v287_v4  ;;  %v336_v17 = vadd.f32 (!%p690_p10), %v335_v11, %v333_v5  ;;  %v342_v20 = vadd.f32 (!%p690_p10), %v341_v14, %v334_v7 }
  0x71   : > { %v304_v18 = vrot.slane (!%p690_p10), %v284_v8, %v303_v12  ;;  %v308_v19 = vrot.slane (!%p690_p10), %v284_v8, %v307_v13  ;;  %v378_v51 = vsub.s32 (!%p690_p10), %v375_v43, %v302_v6 }
  0x72   : > { %v290_v21 = vrot.slane (!%p690_p10), %v289_v15, 2  ;;  %v296_v22 = vrot.slane (!%p690_p10), %v295_v16, 2  ;;  %v337_v25 = vrot.slane (!%p690_p10), %v336_v17, 2  ;;  %v343_v28 = vrot.slane (!%p690_p10), %v342_v20, 2 }
  0x73   : > { %v311_v26 = vsub.f32 %v286_v3, %v304_v18  ;;  %v312_v27 = vsub.f32 %v287_v4, %v308_v19  ;;  %v349_v29 = vsub.f32 %v333_v5, %v304_v18  ;;  %v350_v33 = vsub.f32 %v334_v7, %v308_v19 }
  0x74   : > { %v291_v30 = vadd.f32 %v290_v21, %v289_v15  ;;  %v297_v31 = vadd.f32 %v296_v22, %v295_v16  ;;  %v338_v32 = vadd.f32 %v337_v25, %v336_v17  ;;  %v344_v36 = vadd.f32 %v343_v28, %v342_v20 }
  0x75   : > { %v313_v34 = vmul.f32 20.0, %v311_v26  ;;  %v314_v35 = vmul.f32 20.0, %v312_v27  ;;  %v351_v37 = vmul.f32 20.0, %v349_v29  ;;  %v352_v41 = vmul.f32 20.0, %v350_v33 }
  0x76   : > { %v292_v38 = vrot.slane %v291_v30, 1  ;;  %v298_v39 = vrot.slane %v297_v31, 1  ;;  %v339_v40 = vrot.slane %v338_v32, 1  ;;  %v345_v44 = vrot.slane %v344_v36, 1 }
  0x77   : > { %v315_v42 = vmax.f32 %v313_v34, %v314_v35  ;;  %v353_v49 = vmax.f32 %v351_v37, %v352_v41 }
  0x78   : > { %v293_v45 = vadd.f32 %v292_v38, %v291_v30  ;;  %v299_v46 = vadd.f32 %v298_v39, %v297_v31  ;;  %v340_v47 = vadd.f32 %v339_v40, %v338_v32  ;;  %v346_v48 = vadd.f32 %v345_v44, %v344_v36 }
  0x79   : > { %316 = vmax.xlane.f32.xlu0 %v315_v42 }
  0x7a   : > { %v347_v50 = vadd.f32 %v340_v47, %v293_v45  ;;  %v348_v52 = vadd.f32 %v346_v48, %v299_v46 }
  0x7c   : > { %v372_v53 = vcombine.low %v347_v50, %v348_v52 }
  0x7d   : > { %354 = vmax.xlane.f32.xlu0 %v353_v49 }
  0x7e   : > { %v379_v54 = vrot.slane %v372_v53, %v378_v51 }
  0x80   : > { %v386_v55 = vrot.slane %v379_v54, %v378_v51 }
  0x82   : > { %392 = vst.msk [vmem:[%s1332_s9] sm:$0x3] %vm390_vm0, %v386_v55 }
 0x106   : > { %v317_v57 = vpop.xlane.xlu0 %316 }
 0x107   : > { %v318_v58 = vsub.f32 %v313_v34, %v317_v57  ;;  %v319_v59 = vsub.f32 %v314_v35, %v317_v57 }
 0x109   : > { %v320_v60 = vmul.f32 1.442695, %v318_v58  ;;  %v322_v61 = vmul.f32 1.442695, %v319_v59 }
 0x10a   : > { %v355_v62 = vpop.xlane.xlu0 %354 }
 0x10b   : > { %824 = vpow2.f32 %v320_v60  ;;  %v356_v63 = vsub.f32 %v351_v37, %v355_v62  ;;  %v357_v0 = vsub.f32 %v352_v41, %v355_v62 }
 0x10c   : > { %826 = vpow2.f32 %v322_v61 }
 0x10d   : > { %v358_v1 = vmul.f32 1.442695, %v356_v63  ;;  %v360_v2 = vmul.f32 1.442695, %v357_v0 }
 0x10f   : > { %828 = vpow2.f32 %v358_v1 }
 0x110   : > { %830 = vpow2.f32 %v360_v2 }
 0x115   : > { %v825_v3 = vpop.eup %824 }
 0x116   : > { %v827_v4 = vpop.eup %826  ;;  %324 = vst [vmem:[#allocation2] sm:$0xff] %v825_v3 }
 0x117   : > { %325 = vst [vmem:[#allocation2 + $0x8] sm:$0xff] %v827_v4  ;;  %v326_v5 = vadd.f32 %v827_v4, %v825_v3 }
 0x119   : > { %v829_v6 = vpop.eup %828  ;;  %327 = vadd.xlane.f32.xlu1 %v326_v5 }
 0x11a   : > { %v831_v7 = vpop.eup %830  ;;  %363 = vst [vmem:[#allocation2 + $0x10] sm:$0xff] %v829_v6 }
 0x11b   : > { %364 = vst [vmem:[#allocation2 + $0x18] sm:$0xff] %v831_v7  ;;  %v365_v8 = vadd.f32 %v831_v7, %v829_v6 }
 0x11d   : > { %366 = vadd.xlane.f32.xlu1 %v365_v8 }
 0x1a6   : > { %v328_v9 = vpop.xlane.xlu1 %327 }
 0x1a7   : > { %330 = vst.msk [vmem:[#allocation3] sm:$0xff] %vm329_vm1, %v328_v9 }
 0x1aa   : > { %v367_v10 = vpop.xlane.xlu1 %366 }
 0x1ab   : > { %369 = vst.msk [vmem:[#allocation3 + $0x8] sm:$0xff] %vm329_vm1, %v367_v10 }
 0x1ac PF: > { %v400_v11 = vld [vmem:[%s237_s10] sm:$0xff]  ;;  %v423_v18 = vld [vmem:[#allocation2] sm:$0xff]  ;;  %vm421_vm2 = vcmask 7168  }
 0x1ad   : > { %v401_v12 = vunpack.c.l.bf16 %v400_v11  ;;  %v402_v13 = vunpack.c.h.bf16 %v400_v11  ;;  %v424_v19 = vld [vmem:[#allocation2 + $0x8] sm:$0xff]  ;;  %v430_v30 = vld [vmem:[#allocation4] sm:$0xff] }
 0x1af   : > { %v403_v14 = vmul.f32 10.0, %v401_v12  ;;  %v404_v15 = vmul.f32 10.0, %v402_v13  ;;  %v419_v35 = vld [vmem:[#allocation7] sm:$0xff] }
 0x1b1   : > { %v405_v16 = vmax.f32 %v403_v14, %v404_v15 }
 0x1b3   : > { %406 = vmax.xlane.f32.xlu0 %v405_v16 }
 0x240   : > { %v407_v17 = vpop.xlane.xlu0 %406 }
 0x241   : > { %v408_v20 = vsub.f32 %v403_v14, %v407_v17  ;;  %v409_v21 = vsub.f32 %v404_v15, %v407_v17 }
 0x243   : > { %v410_v22 = vmul.f32 1.442695, %v408_v20  ;;  %v412_v23 = vmul.f32 1.442695, %v409_v21  ;;  %v425_v24 = vmul.f32 %v423_v18, %v408_v20  ;;  %v426_v25 = vmul.f32 %v424_v19, %v409_v21 }
 0x245   : > { %832 = vpow2.f32 %v410_v22  ;;  %v427_v26 = vadd.f32 %v426_v25, %v425_v24 }
 0x246   : > { %834 = vpow2.f32 %v412_v23 }
 0x247   : > { %428 = vadd.xlane.f32.xlu1 %v427_v26 }
 0x24f   : > { %v833_v27 = vpop.eup %832 }
 0x250   : > { %v835_v28 = vpop.eup %834 }
 0x251   : > { %v414_v29 = vadd.f32 %v835_v28, %v833_v27 }
 0x253   : > { %415 = vadd.xlane.f32.xlu0 %v414_v29 }
 0x2d4   : > { %v429_v31 = vpop.xlane.xlu1 %428 }
 0x2d5   : > { %v431_v32 = vadd.f32 %v430_v30, %v429_v31  ;;  %436 = vst.msk [vmem:[#allocation5] sm:$0xff] (!%p690_p10), %vm421_vm2, %v429_v31 }
 0x2d7   : > { %432 = vst.msk [vmem:[#allocation4] sm:$0xff] %vm421_vm2, %v431_v32 }
 0x2e0   : > { %v416_v33 = vpop.xlane.xlu0 %415 }
 0x2e1   : > { %836 = vlog2.f32 %v416_v33 }
 0x2ea   : > { %435 = sbr.rel (%p690_p10) target bundleno = 753 (0x2f1), region = 48 }
 0x2eb   : > { %v837_v34 = vpop.eup %836 }
 0x2ec   : > { %v418_v36 = vmul.f32 0.6931472, %v837_v34 }
 0x2ee   : > { %v420_v37 = vadd.f32 %v419_v35, %v418_v36  ;;  %437 = vst.msk [vmem:[#allocation6] sm:$0xff] (!%p690_p10), %vm421_vm2, %v418_v36 }
 0x2f0   : > { %422 = vst.msk [vmem:[#allocation7] sm:$0xff] %vm421_vm2, %v420_v37 }
 0x2f1 PF: > { %v439_v38 = vld [vmem:[#allocation2 + $0x10] sm:$0xff]  ;;  %v440_v39 = vld [vmem:[#allocation2 + $0x18] sm:$0xff]  ;;  %p693_p0 = scmp.ne.s32.totalorder %s1044_s21, 1 }
 0x2f2   : > { %v441_v40 = vmul.f32 %v439_v38, %v408_v20  ;;  %v442_v41 = vmul.f32 %v440_v39, %v409_v21  ;;  %v447_v43 = vld [vmem:[#allocation4 + $0x8] sm:$0xff]  ;;  %457 = vst.msk [vmem:[#allocation6 + $0x8] sm:$0xff] (!%p693_p0), %vm421_vm2, %v418_v36 }
 0x2f4   : > { %v443_v42 = vadd.f32 %v442_v41, %v441_v40 }
 0x2f6   : > { %444 = vadd.xlane.f32.xlu0 %v443_v42 }
 0x380   : > { %453 = sbr.rel (%p693_p0) target bundleno = 903 (0x387), region = 52 }
 0x383   : > { %v445_v44 = vpop.xlane.xlu0 %444 }
 0x384   : > { %v448_v45 = vadd.f32 %v447_v43, %v445_v44  ;;  %455 = vst.msk [vmem:[#allocation5 + $0x8] sm:$0xff] (!%p693_p0), %vm421_vm2, %v445_v44 }
 0x386   : > { %449 = vst.msk [vmem:[#allocation4 + $0x8] sm:$0xff] %vm421_vm2, %v448_v45 }
 0x387 PF: > { %p694_p12 = scmp.ne.s32.totalorder %s1044_s21, 3 }
 0x388   : > { %v465_v46 = vld [vmem:[#allocation3] sm:$0xff] (!%p694_p12)  ;;  %v488_v47 = vld [vmem:[#allocation3 + $0x8] sm:$0xff] (!%p694_p12)  ;;  %v463_v49 = vld [vmem:[#allocation4] sm:$0xff] (!%p694_p12) }
 0x389   : > { %461 = sbr.rel (%p694_p12) target bundleno = 1133 (0x46d), region = 56  ;;  %838 = vrcp.f32 (!%p694_p12), %v465_v46  ;;  %v462_v48 = vld [vmem:[#allocation5] sm:$0xff] (!%p694_p12)  ;;  %v469_v51 = vld [vmem:[#allocation6] sm:$0xff] (!%p694_p12)  ;;  %v492_v55 = vld [vmem:[#allocation6 + $0x8] sm:$0xff] (!%p694_p12) }
 0x38a   : > { %840 = vrcp.f32 (!%p694_p12), %v488_v47  ;;  %v468_v50 = vld [vmem:[#allocation7] sm:$0xff] (!%p694_p12)  ;;  %v464_v54 = vsub.f32 (!%p694_p12), %v462_v48, %v463_v49 }
 0x38b   : > { %v484_v52 = vld [vmem:[#allocation5 + $0x8] sm:$0xff] (!%p694_p12)  ;;  %v470_v56 = vsub.f32 (!%p694_p12), %v468_v50, %v469_v51  ;;  %v493_v60 = vsub.f32 (!%p694_p12), %v468_v50, %v492_v55 }
 0x38d   : > { %v485_v53 = vld [vmem:[#allocation4 + $0x8] sm:$0xff] (!%p694_p12) }
 0x38e   : > { %v486_v57 = vsub.f32 (!%p694_p12), %v484_v52, %v485_v53 }
 0x393   : > { %v839_v58 = vpop.eup %838 }
 0x394   : > { %v467_v59 = vmul.f32 %v839_v58, %v464_v54  ;;  %v841_v61 = vpop.eup %840 }
 0x395   : > { %v490_v63 = vmul.f32 %v841_v61, %v486_v57 }
 0x396   : > { %v471_v62 = vadd.f32 %v470_v56, %v467_v59 }
 0x397   : > { %v494_v1 = vadd.f32 %v493_v60, %v490_v63 }
 0x398   : > { %v472_v0 = vsel %vm421_vm2, %v471_v62, 0.0 }
 0x399   : > { %473 = vadd.xlane.f32.xlu0 %v472_v0  ;;  %v495_v2 = vsel %vm421_vm2, %v494_v1, 0.0 }
 0x39d   : > { %496 = vadd.xlane.f32.xlu0 %v495_v2 }
 0x426   : > { %v474_v3 = vpop.xlane.xlu0 %473 }
 0x427   : > { %v475_v4 = vrot.slane %v474_v3, 4 }
 0x429   : > { %v476_v5 = vadd.f32 %v475_v4, %v474_v3 }
 0x42a   : > { %v497_v6 = vpop.xlane.xlu0 %496 }
 0x42b   : > { %v477_v7 = vrot.slane %v476_v5, 2  ;;  %v498_v8 = vrot.slane %v497_v6, 4 }
 0x42d   : > { %v499_v9 = vadd.f32 %v498_v8, %v497_v6  ;;  %v478_v10 = vadd.f32 %v477_v7, %v476_v5 }
 0x42f   : > { %v500_v11 = vrot.slane %v499_v9, 2  ;;  %v479_v12 = vrot.slane %v478_v10, 1 }
 0x431   : > { %v501_v13 = vadd.f32 %v500_v11, %v499_v9  ;;  %v480_v14 = vadd.f32 %v479_v12, %v478_v10 }
 0x433   : > { %703 = vpush %v480_v14  ;;  %v502_v15 = vrot.slane %v501_v13, 1 }
 0x435   : > { %v503_v16 = vadd.f32 %v502_v15, %v501_v13 }
 0x437   : > { %705 = vpush %v503_v16 }
 0x464   : > { %s704_s21 = spop %703 }
 0x468   : > { %s706_s6 = spop %705 }
 0x469   : > { %s505_s15 = sadd.f32 %s706_s6, %s704_s21 }
 0x46b   : > { %v506_v17 = vstv %s505_s15 }
 0x46c   : > { %507 = vst [vmem:[%s272_s26] sm:$0x1] %v506_v17 }
 0x46d PF: > { %s696_s12 = sshll.u32 %s1048_s22, 4  ;;  %s526_s10 = sshll.u32 %s272_s26, 4  ;;  %s527_s10 = int_to_ptr.vmem [resolvable:$true] %s526_s10 }
 0x46e   : > { %s1371_s8 = scalar_lea.hbm %s1458_s3, %s696_s12  ;;  %s509_s13 = scalar_lea.sflag [#allocation10], %s1322_s29 }
 0x46f   : > { %s902_s7 = scalar_lea.vmem %s527_s10, 16  ;;  %p1486_p3 = scmp.ne.s32.totalorder %s1478_s5, 0 }
 0x470   : > { %p903_p1 = scmp.ne.s32.totalorder %s527_s10, %s902_s7  ;;  %s1069_s20 = smov [#allocation13]  }
 0x471   : > { %s906_s28 = sshll.u32 %s1069_s20, 4  ;;  %s907_s28 = int_to_ptr.vmem [resolvable:$false] %s906_s28 }
 0x472   : > { %p904_p2 = pnand %p903_p1, %p1486_p3  ;;  %s908_s18 = scalar_lea.vmem %s907_s28, 32 }
 0x473   : > { %p909_p7 = scmp.lt.s32.totalorder %s527_s10, %s907_s28  ;;  %p910_p6 = scmp.lt.s32.totalorder %s908_s18, %s902_s7 }
 0x474   : > { %p905_p5 = pneg %p904_p2 }
 0x475   : > { %p911_p4 = por %p910_p6, %p909_p7 }
 0x477   : > { %p912_p9 = pnand %p911_p4, %p905_p5 }
 0x479   : > { %915 = shalt.err (!%p912_p9)
}
 0x47a   : > { %s916_s26 = scalar_lea.hbm %s1371_s8, 16  ;;  %s920_s6 = scalar_lea.hbm %s1458_s3, 32 }
 0x47b   : > { %p917_p11 = scmp.ne.s32.totalorder %s1371_s8, %s916_s26  ;;  %p921_p10 = scmp.lt.u32.totalorder %s1371_s8, %s1458_s3 }
 0x47c   : > { %p922_p0 = scmp.lt.u32.totalorder %s920_s6, %s916_s26  ;;  %p924_p1 = scmp.lt.u32.totalorder %s916_s26, %s1371_s8 }
 0x47d   : > { %p918_p13 = pnand %p917_p11, %p1486_p3 }
 0x47e   : > { %p923_p12 = por %p922_p0, %p921_p10 }
 0x47f   : > { %p919_p8 = pneg %p918_p13 }
 0x480   : > { %p925_p2 = por %p924_p1, %p923_p12 }
 0x482   : > { %p926_p5 = pnand %p925_p2, %p919_p8 }
 0x484   : > { %929 = shalt.err (!%p926_p5)
}
 0x485   : > { %711 = dma.vmem_to_hbm [thread:$0]  (%p1486_p3), %s527_s10, 16, %s1371_s8, %s509_s13  }
 0x486   : > { %s702_s11 = sshll.u32 %s1048_s22, 5  ;;  %s540_s14 = sshll.u32 %s1332_s9, 4  ;;  %s541_s14 = int_to_ptr.vmem [resolvable:$true] %s540_s14 }
 0x487   : > { %s1398_s28 = scalar_lea.hbm %s1459_s4, %s702_s11  ;;  %s513_s18 = scalar_lea.sflag [#allocation15], %s1322_s29 }
 0x488   : > { %s930_s26 = scalar_lea.vmem %s541_s14, 32  ;;  %s1070_s27 = smov [#allocation14]  }
 0x489   : > { %p931_p7 = scmp.ne.s32.totalorder %s541_s14, %s930_s26  ;;  %s934_s21 = sshll.u32 %s1070_s27, 4  ;;  %s935_s21 = int_to_ptr.vmem [resolvable:$false] %s934_s21 }
 0x48a   : > { %s936_s6 = scalar_lea.vmem %s935_s21, 64  ;;  %p937_p9 = scmp.lt.s32.totalorder %s541_s14, %s935_s21 }
 0x48b   : > { %p932_p6 = pnand %p931_p7, %p1486_p3  ;;  %p938_p11 = scmp.lt.s32.totalorder %s936_s6, %s930_s26 }
 0x48d   : > { %p933_p4 = pneg %p932_p6  ;;  %p939_p13 = por %p938_p11, %p937_p9 }
 0x48f   : > { %p940_p8 = pnand %p939_p13, %p933_p4 }
 0x491   : > { %943 = shalt.err (!%p940_p8)
}
 0x492   : > { %s944_s22 = scalar_lea.hbm %s1398_s28, 32  ;;  %s948_s8 = scalar_lea.hbm %s1459_s4, 64 }
 0x493   : > { %p945_p10 = scmp.ne.s32.totalorder %s1398_s28, %s944_s22  ;;  %p949_p1 = scmp.lt.u32.totalorder %s1398_s28, %s1459_s4 }
 0x494   : > { %p950_p2 = scmp.lt.u32.totalorder %s948_s8, %s944_s22  ;;  %p952_p7 = scmp.lt.u32.totalorder %s944_s22, %s1398_s28 }
 0x495   : > { %p946_p0 = pnand %p945_p10, %p1486_p3 }
 0x496   : > { %p951_p5 = por %p950_p2, %p949_p1 }
 0x497   : > { %p947_p12 = pneg %p946_p0 }
 0x498   : > { %p953_p6 = por %p952_p7, %p951_p5 }
 0x49a   : > { %p954_p4 = pnand %p953_p6, %p947_p12 }
 0x49c   : > { %957 = shalt.err (!%p954_p4)
}
 0x49d   : > { %712 = dma.vmem_to_hbm [thread:$0]  (%p1486_p3), %s541_s14, 32, %s1398_s28, %s513_s18  }
 0x49e PF: > { %s1487_s15 = sld [smem:[#allocation20_spill]]  ;;  %p730_p9 = scmp.ge.s32.totalorder %s1060_s25, 2 }
 0x49f   : > { %p1488_p11 = scmp.ne.s32.totalorder %s1479_s30, 0 }
 0x4a1   : > { %p723_p13 = pnand %p730_p9, %p1488_p11 }
 0x4a4   : > { %s552_s12 = sand.u32 1, %s1487_s15  }
 0x4a5   : > { %s553_s11 = scalar_lea.sflag [#allocation10], %s552_s12 }
 0x4a6   : > { %1011 = dma.done.wait (!%p723_p13), %s553_s11, 16  }
 0x4a7   : > { %1013 = vsyncadd (!%p723_p13), %s553_s11, 4294967280  ;;  %s561_s7 = scalar_lea.sflag [#allocation15], %s552_s12 }
 0x4a8   : > { %1015 = dma.done.wait (!%p723_p13), %s561_s7, 32  }
 0x4a9   : > { %1017 = vsyncadd (!%p723_p13), %s561_s7, 4294967264  ;;  %s27_s25 = sadd.s32 1, %s1060_s25   ;;  %s1489_s5 = sld [smem:[#allocation24_spill]] }
 0x4aa   : > { %p24_p8 = scmp.ge.s32.totalorder %s27_s25, 10   ;;  %s1490_s14 = sld [smem:[#allocation21_spill]] }
 0x4ab   : > { %s1491_s20 = sld [smem:[#allocation25_spill]]  ;;  %s1492_s28 = sld [smem:[#allocation22_spill]] }
 0x4ac   : > { %s1493_s30 = sld [smem:[#allocation23_spill]]  ;;  %s1494_s15 = smov %s1024_s16 }
 0x4ad   : > { %s1495_s16 = smov %s1028_s17  ;;  %s1497_s18 = smov %s1036_s19 }
 0x4ae   : > { %s1499_s21 = smov %s1052_s23  ;;  %s1500_s22 = smov %s1056_s24 }
 0x4af   : > { %s1496_s17 = smov %s1489_s5  ;;  %26 = sbr.rel (!%p24_p8) target bundleno = 13 (0xd), region = 133 }
 0x4b0   : > { %s1498_s19 = smov %s1490_s14 }
 0x4b1   : > { %s1501_s23 = smov %s1492_s28 }
 0x4b2   : > { %s1502_s24 = smov %s1493_s30 }
 0x4b6   :  { %566 = vsyncpa [#allocation9], 1 }
 0x4b7   :  { %568 = vsyncpa [#allocation9 + $0x1], 1 }
 0x4b8   :  { %569 = vsyncpa [#allocation12], 1 }
 0x4b9   :  { %571 = vsyncpa [#allocation12 + $0x1], 1 }
 0x4ba   :  { %572 = vsyncpa [#allocation10], 1 }
 0x4bb   :  { %574 = vsyncpa [#allocation10 + $0x1], 1 }
 0x4bc   :  { %575 = vsyncpa [#allocation15], 1 }
 0x4bd   :  { %577 = vsyncpa [#allocation15 + $0x1], 1 }

</bundles_post_ra>
